<compile_context>
chip_gen: v7x
topology: tpu7x:2x2x1
jax: 0.10.0
libtpu: 0.0.40
codegen_flags: <defaults>
</compile_context>

<pallas_src>
import functools

import jax
import jax.numpy as jnp
from jax import lax
from jax.experimental import pallas as pl
from jax.experimental.pallas import tpu as pltpu  # noqa: F401  (kept for TPU-specific tuning hooks)


def _attn_kernel(q_ref, k_ref, v_ref, o_ref, *, scale, bh, d):
    # q_ref: (BH, Lq, D); k_ref/v_ref: (BH, Lk, D); o_ref: (Lq, BH*D) lane-dense slab.
    head_outs = []
    for b in range(bh):                      # static unroll; BH is tiny (4)
        q = q_ref[b]                         # (Lq, D)
        k = k_ref[b]                         # (Lk, D)
        v = v_ref[b]                         # (Lk, D)

        # scores = q @ k^T without materializing a transpose:
        # contract the last (D) dim of both operands directly on the MXU.
        s = lax.dot_general(
            q, k,
            dimension_numbers=(((1,), (1,)), ((), ())),
            preferred_element_type=jnp.float32,
        )                                    # (Lq, Lk)

        if scale != 1.0:                     # trace-time skip; scale == 1.0 for this model
            s = s * scale

        # numerically-stable softmax over the last axis (matches nn.Softmax(dim=-1))
        m = jnp.max(s, axis=-1, keepdims=True)
        e = jnp.exp(s - m)
        p = e / jnp.sum(e, axis=-1, keepdims=True)

        o = jnp.dot(p, v, preferred_element_type=jnp.float32)   # (Lq, D)
        head_outs.append(o)

    # One unmasked, 128-lane-wide store of all heads.
    o_ref[...] = jnp.concatenate(head_outs, axis=-1).astype(o_ref.dtype)


def sdpa_pallas(query, key, value, *, scale):
    """query: (B, H, Lq, D); key/value: (B, H, Lk, D) -> (B, H, Lq, D)."""
    B, H, Lq, D = query.shape
    Lk = key.shape[2]
    BH = B * H

    q = query.reshape(BH, Lq, D)
    k = key.reshape(BH, Lk, D)
    v = value.reshape(BH, Lk, D)

    kernel = functools.partial(_attn_kernel, scale=scale, bh=BH, d=D)

    out_ld = pl.pallas_call(
        kernel,
        out_shape=jax.ShapeDtypeStruct((Lq, BH * D), query.dtype),
        grid=(1,),
        in_specs=[
            pl.BlockSpec((BH, Lq, D), lambda i: (0, 0, 0)),
            pl.BlockSpec((BH, Lk, D), lambda i: (0, 0, 0)),
            pl.BlockSpec((BH, Lk, D), lambda i: (0, 0, 0)),
        ],
        out_specs=pl.BlockSpec((Lq, BH * D), lambda i: (0, 0)),
    )(q, k, v)

    # Layout plumbing (outside the kernel): (Lq, BH*D) -> (B, H, Lq, D)
    out = out_ld.reshape(Lq, BH, D).transpose(1, 0, 2).reshape(B, H, Lq, D)
    return out


class ModelParams:
    """Mirror of the PyTorch module's __init__ (dim=1, num_heads=1, dropout=1).

    The nn.Linear layers (qwk, wk, vw) are defined but unused in forward();
    we still materialize them deterministically for shape fidelity.
    """

    def __init__(self, dim=1, num_heads=1, dropout_p=1.0, key=None):
        self.dim = dim
        self.num_heads = num_heads
        self.dropout_p = dropout_p
        self.scale_factor = float((dim // num_heads) ** (-0.5))
        if key is None:
            key = jax.random.PRNGKey(42)
        k1, k2, k3, k4, k5, k6 = jax.random.split(key, 6)
        bound = 1.0 / (dim ** 0.5)
        self.qwk_w = jax.random.uniform(k1, (dim, dim), jnp.float32, -bound, bound)
        self.qwk_b = jax.random.uniform(k2, (dim,), jnp.float32, -bound, bound)
        self.wk_w = jax.random.uniform(k3, (dim, dim), jnp.float32, -bound, bound)
        self.wk_b = jax.random.uniform(k4, (dim,), jnp.float32, -bound, bound)
        self.vw_w = jax.random.uniform(k5, (dim, dim), jnp.float32, -bound, bound)
        self.vw_b = jax.random.uniform(k6, (dim,), jnp.float32, -bound, bound)

    def forward(self, query, key, value):
        return sdpa_pallas(query, key, value, scale=self.scale_factor)


def _reference(query, key, value, scale):
    s = jnp.einsum("bhqd,bhkd->bhqk", query, key) * scale
    p = jax.nn.softmax(s, axis=-1)
    return jnp.einsum("bhqk,bhkd->bhqd", p, value)


if __name__ == "__main__":
    # Shapes implied by the module's example tensors:
    #   query: (1, 4, 10, 32), key/value: (1, 4, 2, 32)
    rng = jax.random.PRNGKey(0)
    kq, kk, kv = jax.random.split(rng, 3)
    query = jax.random.normal(kq, (1, 4, 10, 32), jnp.float32)
    key = jax.random.normal(kk, (1, 4, 2, 32), jnp.float32)
    value = jax.random.normal(kv, (1, 4, 2, 32), jnp.float32)

    model = ModelParams(dim=1, num_heads=1, dropout_p=1.0)
    out = model.forward(query, key, value)
    out = jax.block_until_ready(out)

    ref = _reference(query, key, value, model.scale_factor)
    assert out.shape == (1, 4, 10, 32), out.shape
    assert jnp.allclose(out, ref, atol=1e-5, rtol=1e-5), "mismatch vs reference"

    print("KERNEL_OK")
</pallas_src>

<mosaic_0001>
module attributes {stable_mosaic.version = 11 : i64} {
  func.func @_attn_kernel(%arg0: i32, %arg1: memref<4x10x32xf32, #tpu.memory_space<vmem>>, %arg2: memref<4x2x32xf32, #tpu.memory_space<vmem>>, %arg3: memref<4x2x32xf32, #tpu.memory_space<vmem>>, %arg4: memref<10x128xf32, #tpu.memory_space<vmem>>) attributes {dimension_semantics = [#tpu.dimension_semantics<arbitrary>], iteration_bounds = array<i64: 1>, scalar_prefetch = 0 : i64, scratch_operands = 0 : i64, tpu.core_type = #tpu.core_type<tc>, window_params = [{pipeline_mode = #tpu.pipeline_mode<synchronous>, transform_indices = @transform_0, window_bounds = array<i64: 4, 10, 32>}, {pipeline_mode = #tpu.pipeline_mode<synchronous>, transform_indices = @transform_1, window_bounds = array<i64: 4, 2, 32>}, {pipeline_mode = #tpu.pipeline_mode<synchronous>, transform_indices = @transform_2, window_bounds = array<i64: 4, 2, 32>}, {pipeline_mode = #tpu.pipeline_mode<synchronous>, transform_indices = @transform_3, window_bounds = array<i64: 10, 128>}]} {
    %c0 = arith.constant 0 : index
    %c0_0 = arith.constant 0 : index
    %c0_1 = arith.constant 0 : index
    %0 = vector.load %arg1[%c0, %c0_0, %c0_1] : memref<4x10x32xf32, #tpu.memory_space<vmem>>, vector<1x10x32xf32>
    %1 = vector.shape_cast %0 : vector<1x10x32xf32> to vector<10x32xf32>
    %c0_2 = arith.constant 0 : index
    %c0_3 = arith.constant 0 : index
    %c0_4 = arith.constant 0 : index
    %2 = vector.load %arg2[%c0_2, %c0_3, %c0_4] : memref<4x2x32xf32, #tpu.memory_space<vmem>>, vector<1x2x32xf32>
    %3 = vector.shape_cast %2 : vector<1x2x32xf32> to vector<2x32xf32>
    %c0_5 = arith.constant 0 : index
    %c0_6 = arith.constant 0 : index
    %c0_7 = arith.constant 0 : index
    %4 = vector.load %arg3[%c0_5, %c0_6, %c0_7] : memref<4x2x32xf32, #tpu.memory_space<vmem>>, vector<1x2x32xf32>
    %5 = vector.shape_cast %4 : vector<1x2x32xf32> to vector<2x32xf32>
    %cst = arith.constant dense<0.000000e+00> : vector<10x2xf32>
    %6 = tpu.matmul %1, %3, %cst {dimension_numbers = #tpu.dot_dimension_numbers<[1], [1], [0], [0], [0, 0, 1, 0], [], []>} : vector<10x32xf32>, vector<2x32xf32>, vector<10x2xf32> -> vector<10x2xf32>
    %cst_8 = arith.constant dense<0xFF800000> : vector<10xf32>
    %7 = vector.multi_reduction <maximumf>, %6, %cst_8 [1] : vector<10x2xf32> to vector<10xf32>
    %8 = vector.shape_cast %7 : vector<10xf32> to vector<10x1xf32>
    %9 = vector.broadcast %8 : vector<10x1xf32> to vector<10x2xf32>
    %10 = arith.subf %6, %9 : vector<10x2xf32>
    %11 = math.exp %10 : vector<10x2xf32>
    %cst_9 = arith.constant dense<0.000000e+00> : vector<10xf32>
    %12 = vector.multi_reduction <add>, %11, %cst_9 [1] : vector<10x2xf32> to vector<10xf32>
    %13 = vector.shape_cast %12 : vector<10xf32> to vector<10x1xf32>
    %14 = vector.broadcast %13 : vector<10x1xf32> to vector<10x2xf32>
    %15 = arith.divf %11, %14 : vector<10x2xf32>
    %cst_10 = arith.constant dense<0.000000e+00> : vector<10x32xf32>
    %16 = tpu.matmul %15, %5, %cst_10 {dimension_numbers = #tpu.dot_dimension_numbers<[1], [0], [0], [1], [0, 0, 1, 1], [], []>} : vector<10x2xf32>, vector<2x32xf32>, vector<10x32xf32> -> vector<10x32xf32>
    %c1 = arith.constant 1 : index
    %c0_11 = arith.constant 0 : index
    %c0_12 = arith.constant 0 : index
    %17 = vector.load %arg1[%c1, %c0_11, %c0_12] : memref<4x10x32xf32, #tpu.memory_space<vmem>>, vector<1x10x32xf32>
    %18 = vector.shape_cast %17 : vector<1x10x32xf32> to vector<10x32xf32>
    %c1_13 = arith.constant 1 : index
    %c0_14 = arith.constant 0 : index
    %c0_15 = arith.constant 0 : index
    %19 = vector.load %arg2[%c1_13, %c0_14, %c0_15] : memref<4x2x32xf32, #tpu.memory_space<vmem>>, vector<1x2x32xf32>
    %20 = vector.shape_cast %19 : vector<1x2x32xf32> to vector<2x32xf32>
    %c1_16 = arith.constant 1 : index
    %c0_17 = arith.constant 0 : index
    %c0_18 = arith.constant 0 : index
    %21 = vector.load %arg3[%c1_16, %c0_17, %c0_18] : memref<4x2x32xf32, #tpu.memory_space<vmem>>, vector<1x2x32xf32>
    %22 = vector.shape_cast %21 : vector<1x2x32xf32> to vector<2x32xf32>
    %cst_19 = arith.constant dense<0.000000e+00> : vector<10x2xf32>
    %23 = tpu.matmul %18, %20, %cst_19 {dimension_numbers = #tpu.dot_dimension_numbers<[1], [1], [0], [0], [0, 0, 1, 0], [], []>} : vector<10x32xf32>, vector<2x32xf32>, vector<10x2xf32> -> vector<10x2xf32>
    %cst_20 = arith.constant dense<0xFF800000> : vector<10xf32>
    %24 = vector.multi_reduction <maximumf>, %23, %cst_20 [1] : vector<10x2xf32> to vector<10xf32>
    %25 = vector.shape_cast %24 : vector<10xf32> to vector<10x1xf32>
    %26 = vector.broadcast %25 : vector<10x1xf32> to vector<10x2xf32>
    %27 = arith.subf %23, %26 : vector<10x2xf32>
    %28 = math.exp %27 : vector<10x2xf32>
    %cst_21 = arith.constant dense<0.000000e+00> : vector<10xf32>
    %29 = vector.multi_reduction <add>, %28, %cst_21 [1] : vector<10x2xf32> to vector<10xf32>
    %30 = vector.shape_cast %29 : vector<10xf32> to vector<10x1xf32>
    %31 = vector.broadcast %30 : vector<10x1xf32> to vector<10x2xf32>
    %32 = arith.divf %28, %31 : vector<10x2xf32>
    %cst_22 = arith.constant dense<0.000000e+00> : vector<10x32xf32>
    %33 = tpu.matmul %32, %22, %cst_22 {dimension_numbers = #tpu.dot_dimension_numbers<[1], [0], [0], [1], [0, 0, 1, 1], [], []>} : vector<10x2xf32>, vector<2x32xf32>, vector<10x32xf32> -> vector<10x32xf32>
    %c2 = arith.constant 2 : index
    %c0_23 = arith.constant 0 : index
    %c0_24 = arith.constant 0 : index
    %34 = vector.load %arg1[%c2, %c0_23, %c0_24] : memref<4x10x32xf32, #tpu.memory_space<vmem>>, vector<1x10x32xf32>
    %35 = vector.shape_cast %34 : vector<1x10x32xf32> to vector<10x32xf32>
    %c2_25 = arith.constant 2 : index
    %c0_26 = arith.constant 0 : index
    %c0_27 = arith.constant 0 : index
    %36 = vector.load %arg2[%c2_25, %c0_26, %c0_27] : memref<4x2x32xf32, #tpu.memory_space<vmem>>, vector<1x2x32xf32>
    %37 = vector.shape_cast %36 : vector<1x2x32xf32> to vector<2x32xf32>
    %c2_28 = arith.constant 2 : index
    %c0_29 = arith.constant 0 : index
    %c0_30 = arith.constant 0 : index
    %38 = vector.load %arg3[%c2_28, %c0_29, %c0_30] : memref<4x2x32xf32, #tpu.memory_space<vmem>>, vector<1x2x32xf32>
    %39 = vector.shape_cast %38 : vector<1x2x32xf32> to vector<2x32xf32>
    %cst_31 = arith.constant dense<0.000000e+00> : vector<10x2xf32>
    %40 = tpu.matmul %35, %37, %cst_31 {dimension_numbers = #tpu.dot_dimension_numbers<[1], [1], [0], [0], [0, 0, 1, 0], [], []>} : vector<10x32xf32>, vector<2x32xf32>, vector<10x2xf32> -> vector<10x2xf32>
    %cst_32 = arith.constant dense<0xFF800000> : vector<10xf32>
    %41 = vector.multi_reduction <maximumf>, %40, %cst_32 [1] : vector<10x2xf32> to vector<10xf32>
    %42 = vector.shape_cast %41 : vector<10xf32> to vector<10x1xf32>
    %43 = vector.broadcast %42 : vector<10x1xf32> to vector<10x2xf32>
    %44 = arith.subf %40, %43 : vector<10x2xf32>
    %45 = math.exp %44 : vector<10x2xf32>
    %cst_33 = arith.constant dense<0.000000e+00> : vector<10xf32>
    %46 = vector.multi_reduction <add>, %45, %cst_33 [1] : vector<10x2xf32> to vector<10xf32>
    %47 = vector.shape_cast %46 : vector<10xf32> to vector<10x1xf32>
    %48 = vector.broadcast %47 : vector<10x1xf32> to vector<10x2xf32>
    %49 = arith.divf %45, %48 : vector<10x2xf32>
    %cst_34 = arith.constant dense<0.000000e+00> : vector<10x32xf32>
    %50 = tpu.matmul %49, %39, %cst_34 {dimension_numbers = #tpu.dot_dimension_numbers<[1], [0], [0], [1], [0, 0, 1, 1], [], []>} : vector<10x2xf32>, vector<2x32xf32>, vector<10x32xf32> -> vector<10x32xf32>
    %c3 = arith.constant 3 : index
    %c0_35 = arith.constant 0 : index
    %c0_36 = arith.constant 0 : index
    %51 = vector.load %arg1[%c3, %c0_35, %c0_36] : memref<4x10x32xf32, #tpu.memory_space<vmem>>, vector<1x10x32xf32>
    %52 = vector.shape_cast %51 : vector<1x10x32xf32> to vector<10x32xf32>
    %c3_37 = arith.constant 3 : index
    %c0_38 = arith.constant 0 : index
    %c0_39 = arith.constant 0 : index
    %53 = vector.load %arg2[%c3_37, %c0_38, %c0_39] : memref<4x2x32xf32, #tpu.memory_space<vmem>>, vector<1x2x32xf32>
    %54 = vector.shape_cast %53 : vector<1x2x32xf32> to vector<2x32xf32>
    %c3_40 = arith.constant 3 : index
    %c0_41 = arith.constant 0 : index
    %c0_42 = arith.constant 0 : index
    %55 = vector.load %arg3[%c3_40, %c0_41, %c0_42] : memref<4x2x32xf32, #tpu.memory_space<vmem>>, vector<1x2x32xf32>
    %56 = vector.shape_cast %55 : vector<1x2x32xf32> to vector<2x32xf32>
    %cst_43 = arith.constant dense<0.000000e+00> : vector<10x2xf32>
    %57 = tpu.matmul %52, %54, %cst_43 {dimension_numbers = #tpu.dot_dimension_numbers<[1], [1], [0], [0], [0, 0, 1, 0], [], []>} : vector<10x32xf32>, vector<2x32xf32>, vector<10x2xf32> -> vector<10x2xf32>
    %cst_44 = arith.constant dense<0xFF800000> : vector<10xf32>
    %58 = vector.multi_reduction <maximumf>, %57, %cst_44 [1] : vector<10x2xf32> to vector<10xf32>
    %59 = vector.shape_cast %58 : vector<10xf32> to vector<10x1xf32>
    %60 = vector.broadcast %59 : vector<10x1xf32> to vector<10x2xf32>
    %61 = arith.subf %57, %60 : vector<10x2xf32>
    %62 = math.exp %61 : vector<10x2xf32>
    %cst_45 = arith.constant dense<0.000000e+00> : vector<10xf32>
    %63 = vector.multi_reduction <add>, %62, %cst_45 [1] : vector<10x2xf32> to vector<10xf32>
    %64 = vector.shape_cast %63 : vector<10xf32> to vector<10x1xf32>
    %65 = vector.broadcast %64 : vector<10x1xf32> to vector<10x2xf32>
    %66 = arith.divf %62, %65 : vector<10x2xf32>
    %cst_46 = arith.constant dense<0.000000e+00> : vector<10x32xf32>
    %67 = tpu.matmul %66, %56, %cst_46 {dimension_numbers = #tpu.dot_dimension_numbers<[1], [0], [0], [1], [0, 0, 1, 1], [], []>} : vector<10x2xf32>, vector<2x32xf32>, vector<10x32xf32> -> vector<10x32xf32>
    %68 = tpu.concatenate %16, %33, %50, %67 in 1 : vector<10x32xf32>, vector<10x32xf32>, vector<10x32xf32>, vector<10x32xf32> -> vector<10x128xf32>
    %c0_47 = arith.constant 0 : index
    %c0_48 = arith.constant 0 : index
    %69 = vector.load %arg4[%c0_47, %c0_48] : memref<10x128xf32, #tpu.memory_space<vmem>>, vector<10x128xf32>
    tpu.vector_store %arg4[%c0_47, %c0_48], %68 {strides = array<i32>} : memref<10x128xf32, #tpu.memory_space<vmem>>, vector<10x128xf32>,
    return
  }
  func.func @transform_0(%arg0: i32) -> (i32, i32, i32) {
    %c0_i32 = arith.constant 0 : i32
    %c0_i32_0 = arith.constant 0 : i32
    %c0_i32_1 = arith.constant 0 : i32
    %c0_i32_2 = arith.constant 0 : i32
    return %c0_i32, %c0_i32_0, %c0_i32_1 : i32, i32, i32
  }
  func.func @transform_1(%arg0: i32) -> (i32, i32, i32) {
    %c0_i32 = arith.constant 0 : i32
    %c0_i32_0 = arith.constant 0 : i32
    %c0_i32_1 = arith.constant 0 : i32
    %c0_i32_2 = arith.constant 0 : i32
    return %c0_i32, %c0_i32_0, %c0_i32_1 : i32, i32, i32
  }
  func.func @transform_2(%arg0: i32) -> (i32, i32, i32) {
    %c0_i32 = arith.constant 0 : i32
    %c0_i32_0 = arith.constant 0 : i32
    %c0_i32_1 = arith.constant 0 : i32
    %c0_i32_2 = arith.constant 0 : i32
    return %c0_i32, %c0_i32_0, %c0_i32_1 : i32, i32, i32
  }
  func.func @transform_3(%arg0: i32) -> (i32, i32) {
    %c0_i32 = arith.constant 0 : i32
    %c0_i32_0 = arith.constant 0 : i32
    %c0_i32_1 = arith.constant 0 : i32
    return %c0_i32, %c0_i32_0 : i32, i32
  }
}

</mosaic_0001>

<bundles_post_ra>
// kernel: tpu_custom_call.1
= control target key start
LH: loop header
LB: loop body
LE: loop exit
PB: predicated region body
PF: predicated region fallthrough
CT: control target
= control target key end

     0   :  { %vm19_vm0 = vcmask 261120   ;;  %s1158_s0 = inlined_call_operand.vmem [shape: f32[4,10,32], index: 0, kind: input, shape index: {}]   ;;  %s1159_s1 = inlined_call_operand.vmem [shape: f32[4,2,32], index: 1, kind: input, shape index: {}]   ;;  %s1160_s2 = inlined_call_operand.vmem [shape: f32[4,2,32], index: 2, kind: input, shape index: {}]   ;;  %s1161_s3 = inlined_call_operand.hbm [shape: f32[10,128], index: 3, kind: output, shape index: {}]  }
   0x1   :  { %v17_v0 = vld [vmem:[%s1159_s1] sm:$0x3] }
   0x2   :  { %v15_v1 = vld [vmem:[%s1158_s0] sm:$0xff]  ;;  %914 = vmatprep.subr.msk.mxu0 %vm19_vm0, %v17_v0 }
   0x3   :  { %916 = vmatprep.mubr.msk.f32.mxu0 %vm19_vm0, %v15_v1 }
   0x4   :  { %8 = vsyncpa [#allocation3], 0  ;;  %915 = vmatpush3.xpose.msk.msra.mxu0 %vm19_vm0, %v17_v0  ;;  %v16_v2 = vld [vmem:[%s1158_s0 + $0x8] sm:$0x3]  ;;  %vm104_vm1 = vcmask 15360   ;;  %vm108_vm2 = vcmask 9216  }
   0x5   :  { %v18_v17 = vld [vmem:[%s1160_s2] sm:$0x3]  ;;  %vm134_vm3 = vcmask 1041408   ;;  %v862_v18 = vld [vmem:[%s1159_s1 + $0x2] sm:$0x3]  ;;  %v860_v25 = vld [vmem:[%s1158_s0 + $0x10] sm:$0xff] }
   0x6   :  { %919 = vmatprep.subr.msk.mxu1 %vm134_vm3, %v18_v17  ;;  %v872_v26 = vld [vmem:[%s1159_s1 + $0x4] sm:$0x3]  ;;  %v861_v27 = vld [vmem:[%s1158_s0 + $0x18] sm:$0x3]  ;;  %v882_v29 = vld [vmem:[%s1159_s1 + $0x6] sm:$0x3] }
   0x7   :  { %917 = vmatmul.mubr.msk.f32.vlgmr.msra.gmra.mrb[0].mxu0 %vm19_vm0, %v16_v2  ;;  %920 = vmatpush3.msk.msra.mxu1 %vm134_vm3, %v18_v17  ;;  %v870_v28 = vld [vmem:[%s1158_s0 + $0x20] sm:$0xff]  ;;  %v871_v30 = vld [vmem:[%s1158_s0 + $0x28] sm:$0x3]  ;;  %v880_v31 = vld [vmem:[%s1158_s0 + $0x30] sm:$0xff]  ;;  %s1017_s15 = smov 64   ;;  %s1018_s16 = smov 96  }
   0x8   :  { %924 = vmatprep.subr.msk.mxu1 %vm19_vm0, %v862_v18  ;;  %v881_v32 = vld [vmem:[%s1158_s0 + $0x38] sm:$0x3]  ;;  %vm833_vm4 = vcmask 785408   ;;  %vm830_vm5 = vcmask 523264   ;;  %s1019_s17 = smov [#allocation2]  }
   0x9   :  { %s843_s18 = sshll.u32 %s1019_s17, 4  ;;  %s844_s18 = int_to_ptr.vmem [resolvable:$true] %s843_s18 }
   0xa   :  { %s992_s19 = scalar_lea.vmem %s844_s18, 256  ;;  %p997_p1 = scmp.lt.s32.totalorder %s844_s18, %s844_s18 }
   0xb   :  { %p993_p0 = scmp.ne.s32.totalorder %s844_s18, %s992_s19  ;;  %p998_p2 = scmp.lt.s32.totalorder %s992_s19, %s992_s19 }
   0xd   :  { %p999_p3 = por %p998_p2, %p997_p1 }
   0xf   :  { %p1000_p4 = pnand %p999_p3, %p993_p0 }
  0xda   :  { %v918_v3 = vpop.f32.mrb[0].mxu0 }
  0xdb   :  { %v95_v4 = vpop.f32.mrb[1].mxu0  ;;  %v109_v6 = vsel %vm108_vm2, %v918_v3, -inf }
  0xdc   :  { %v105_v5 = vsel %vm104_vm1, %v95_v4, -inf }
  0xdd   :  { %106 = vmax.xlane.f32.xlu0 %v105_v5 }
  0xe1   :  { %110 = vmax.xlane.f32.xlu0 %v109_v6 }
 0x16a   :  { %v107_v7 = vpop.xlane.xlu0 %106 }
 0x16b   :  { %v112_v8 = vsub.f32 %v95_v4, %v107_v7 }
 0x16d   :  { %v114_v9 = vmul.f32 1.442695, %v112_v8 }
 0x16e   :  { %v111_v10 = vpop.xlane.xlu0 %110 }
 0x16f   :  { %960 = vpow2.f32 %v114_v9  ;;  %v113_v11 = vsub.f32 %v918_v3, %v111_v10 }
 0x171   :  { %v116_v12 = vmul.f32 1.442695, %v113_v11 }
 0x173   :  { %962 = vpow2.f32 %v116_v12 }
 0x179   :  { %v961_v13 = vpop.eup %960 }
 0x17a   :  { %v118_v14 = vsel %vm104_vm1, %v961_v13, 0.0 }
 0x17b   :  { %119 = vadd.xlane.f32.xlu1 %v118_v14  ;;  %v873_v14 = vld [vmem:[%s1160_s2 + $0x4] sm:$0x3] }
 0x17d   :  { %v963_v15 = vpop.eup %962 }
 0x17e   :  { %v121_v16 = vsel %vm108_vm2, %v963_v15, 0.0 }
 0x17f   :  { %122 = vadd.xlane.f32.xlu1 %v121_v16 }
 0x208   :  { %v120_v19 = vpop.xlane.xlu1 %119 }
 0x209   :  { %964 = vrcp.f32 %v120_v19 }
 0x20c   :  { %v123_v20 = vpop.xlane.xlu1 %122 }
 0x20d   :  { %966 = vrcp.f32 %v123_v20 }
 0x213   :  { %v965_v21 = vpop.eup %964 }
 0x214   :  { %v125_v22 = vmul.f32 %v965_v21, %v961_v13  ;;  %v863_v13 = vld [vmem:[%s1160_s2 + $0x2] sm:$0x3] }
 0x215   :  { %929 = vmatprep.subr.msk.mxu0 %vm134_vm3, %v863_v13 }
 0x216   :  { %921 = vmatprep.mubr.msk.f32.mxu1 %vm104_vm1, %v125_v22  ;;  %930 = vmatpush3.msk.msra.mxu0 %vm134_vm3, %v863_v13 }
 0x217   :  { %v967_v23 = vpop.eup %966  ;;  %939 = vmatprep.subr.msk.mxu0 %vm134_vm3, %v873_v14 }
 0x218   :  { %v127_v24 = vmul.f32 %v967_v23, %v963_v15 }
 0x21a   :  { %922 = vmatmul.mubr.msk.f32.vlgmr.msra.gmra.mrb[0].mxu1 %vm104_vm1, %v127_v24 }
 0x21b   :  { %925 = vmatpush3.xpose.msk.msra.mxu1 %vm19_vm0, %v862_v18  ;;  %926 = vmatprep.mubr.msk.f32.mxu1 %vm19_vm0, %v860_v25 }
 0x21c   :  { %934 = vmatprep.subr.msk.mxu1 %vm19_vm0, %v872_v26 }
 0x21e   :  { %927 = vmatmul.mubr.msk.f32.vlgmr.msra.gmra.mrb[2].mxu1 %vm19_vm0, %v861_v27 }
 0x21f   :  { %935 = vmatpush3.xpose.msk.msra.mxu1 %vm19_vm0, %v872_v26  ;;  %936 = vmatprep.mubr.msk.f32.mxu1 %vm19_vm0, %v870_v28  ;;  %v883_v26 = vld [vmem:[%s1160_s2 + $0x6] sm:$0x3]  ;;  %s1016_s2 = smov 32  }
 0x220   :  { %944 = vmatprep.subr.msk.mxu1 %vm19_vm0, %v882_v29 }
 0x222   :  { %937 = vmatmul.mubr.msk.f32.vlgmr.msra.gmra.mrb[4].mxu1 %vm19_vm0, %v871_v30 }
 0x223   :  { %945 = vmatpush3.xpose.msk.msra.mxu1 %vm19_vm0, %v882_v29  ;;  %946 = vmatprep.mubr.msk.f32.mxu1 %vm19_vm0, %v880_v31 }
 0x226   :  { %947 = vmatmul.mubr.msk.f32.vlgmr.msra.gmra.mrb[6].mxu1 %vm19_vm0, %v881_v32 }
 0x2ed   :  { %v1105_v33 = vpop.f32.mrb[0].mxu1 }
 0x2ee   :  { %v1107_v34 = vpop.f32.mrb[1].mxu1 }
 0x2f1   :  { %v928_v35 = vpop.f32.mrb[2].mxu1 }
 0x2f2   :  { %v295_v36 = vpop.f32.mrb[3].mxu1  ;;  %v307_v37 = vsel %vm108_vm2, %v928_v35, -inf }
 0x2f3   :  { %308 = vmax.xlane.f32.xlu1 %v307_v37  ;;  %v304_v38 = vsel %vm104_vm1, %v295_v36, -inf }
 0x2f4   :  { %305 = vmax.xlane.f32.xlu0 %v304_v38 }
 0x2f5   :  { %v938_v39 = vpop.f32.mrb[4].mxu1 }
 0x2f6   :  { %v492_v40 = vpop.f32.mrb[5].mxu1  ;;  %v504_v41 = vsel %vm108_vm2, %v938_v39, -inf }
 0x2f7   :  { %505 = vmax.xlane.f32.xlu1 %v504_v41  ;;  %v501_v42 = vsel %vm104_vm1, %v492_v40, -inf }
 0x2f8   :  { %502 = vmax.xlane.f32.xlu0 %v501_v42 }
 0x2f9   :  { %v948_v43 = vpop.f32.mrb[6].mxu1 }
 0x2fa   :  { %v689_v44 = vpop.f32.mrb[7].mxu1  ;;  %v701_v45 = vsel %vm108_vm2, %v948_v43, -inf }
 0x2fb   :  { %702 = vmax.xlane.f32.xlu1 %v701_v45  ;;  %v698_v46 = vsel %vm104_vm1, %v689_v44, -inf }
 0x2fc   :  { %699 = vmax.xlane.f32.xlu0 %v698_v46 }
 0x380   :  { %v309_v47 = vpop.xlane.xlu1 %308 }
 0x381   :  { %v311_v48 = vsub.f32 %v928_v35, %v309_v47  ;;  %v306_v49 = vpop.xlane.xlu0 %305 }
 0x382   :  { %v310_v50 = vsub.f32 %v295_v36, %v306_v49 }
 0x383   :  { %v314_v51 = vmul.f32 1.442695, %v311_v48 }
 0x384   :  { %v312_v52 = vmul.f32 1.442695, %v310_v50  ;;  %v506_v53 = vpop.xlane.xlu1 %505 }
 0x385   :  { %968 = vpow2.f32 %v314_v51  ;;  %v508_v54 = vsub.f32 %v938_v39, %v506_v53  ;;  %v503_v55 = vpop.xlane.xlu0 %502 }
 0x386   :  { %970 = vpow2.f32 %v312_v52  ;;  %v507_v56 = vsub.f32 %v492_v40, %v503_v55 }
 0x387   :  { %v511_v57 = vmul.f32 1.442695, %v508_v54 }
 0x388   :  { %v509_v58 = vmul.f32 1.442695, %v507_v56  ;;  %v703_v59 = vpop.xlane.xlu1 %702 }
 0x389   :  { %972 = vpow2.f32 %v511_v57  ;;  %v705_v60 = vsub.f32 %v948_v43, %v703_v59  ;;  %v700_v61 = vpop.xlane.xlu0 %699 }
 0x38a   :  { %974 = vpow2.f32 %v509_v58  ;;  %v704_v62 = vsub.f32 %v689_v44, %v700_v61 }
 0x38b   :  { %v708_v63 = vmul.f32 1.442695, %v705_v60 }
 0x38c   :  { %v706_v0 = vmul.f32 1.442695, %v704_v62 }
 0x38d   :  { %976 = vpow2.f32 %v708_v63 }
 0x38e   :  { %978 = vpow2.f32 %v706_v0 }
 0x38f   :  { %v969_v1 = vpop.eup %968 }
 0x390   :  { %v971_v2 = vpop.eup %970  ;;  %v319_v3 = vsel %vm108_vm2, %v969_v1, 0.0 }
 0x391   :  { %320 = vadd.xlane.f32.xlu1 %v319_v3  ;;  %v316_v4 = vsel %vm104_vm1, %v971_v2, 0.0 }
 0x392   :  { %317 = vadd.xlane.f32.xlu0 %v316_v4 }
 0x393   :  { %v973_v5 = vpop.eup %972 }
 0x394   :  { %v975_v6 = vpop.eup %974  ;;  %v516_v7 = vsel %vm108_vm2, %v973_v5, 0.0 }
 0x395   :  { %517 = vadd.xlane.f32.xlu1 %v516_v7  ;;  %v513_v8 = vsel %vm104_vm1, %v975_v6, 0.0 }
 0x396   :  { %514 = vadd.xlane.f32.xlu0 %v513_v8 }
 0x397   :  { %v977_v9 = vpop.eup %976 }
 0x398   :  { %v979_v10 = vpop.eup %978  ;;  %v713_v11 = vsel %vm108_vm2, %v977_v9, 0.0 }
 0x399   :  { %714 = vadd.xlane.f32.xlu1 %v713_v11  ;;  %v710_v12 = vsel %vm104_vm1, %v979_v10, 0.0 }
 0x39a   :  { %711 = vadd.xlane.f32.xlu0 %v710_v12 }
 0x41e   :  { %v321_v15 = vpop.xlane.xlu1 %320 }
 0x41f   :  { %980 = vrcp.f32 %v321_v15  ;;  %v318_v16 = vpop.xlane.xlu0 %317 }
 0x420   :  { %982 = vrcp.f32 %v318_v16 }
 0x422   :  { %v518_v17 = vpop.xlane.xlu1 %517 }
 0x423   :  { %984 = vrcp.f32 %v518_v17  ;;  %v515_v18 = vpop.xlane.xlu0 %514 }
 0x424   :  { %986 = vrcp.f32 %v515_v18 }
 0x426   :  { %v715_v19 = vpop.xlane.xlu1 %714 }
 0x427   :  { %988 = vrcp.f32 %v715_v19  ;;  %v712_v20 = vpop.xlane.xlu0 %711 }
 0x428   :  { %990 = vrcp.f32 %v712_v20 }
 0x429   :  { %v981_v21 = vpop.eup %980 }
 0x42a   :  { %v983_v22 = vpop.eup %982  ;;  %v325_v24 = vmul.f32 %v981_v21, %v969_v1 }
 0x42b   :  { %v323_v23 = vmul.f32 %v983_v22, %v971_v2 }
 0x42d   :  { %v985_v25 = vpop.eup %984  ;;  %931 = vmatprep.mubr.msk.f32.mxu0 %vm104_vm1, %v323_v23 }
 0x42e   :  { %v987_v27 = vpop.eup %986  ;;  %932 = vmatmul.mubr.msk.f32.vlgmr.msra.gmra.mrb[2].mxu0 %vm104_vm1, %v325_v24  ;;  %v522_v29 = vmul.f32 %v985_v25, %v973_v5 }
 0x42f   :  { %940 = vmatpush3.msk.msra.mxu0 %vm134_vm3, %v873_v14  ;;  %v520_v28 = vmul.f32 %v987_v27, %v975_v6 }
 0x430   :  { %949 = vmatprep.subr.msk.mxu0 %vm134_vm3, %v883_v26 }
 0x431   :  { %v989_v30 = vpop.eup %988  ;;  %941 = vmatprep.mubr.msk.f32.mxu0 %vm104_vm1, %v520_v28 }
 0x432   :  { %v991_v31 = vpop.eup %990  ;;  %942 = vmatmul.mubr.msk.f32.vlgmr.msra.gmra.mrb[4].mxu0 %vm104_vm1, %v522_v29  ;;  %v719_v35 = vmul.f32 %v989_v30, %v977_v9 }
 0x433   :  { %950 = vmatpush3.msk.msra.mxu0 %vm134_vm3, %v883_v26  ;;  %v717_v32 = vmul.f32 %v991_v31, %v979_v10 }
 0x435   :  { %951 = vmatprep.mubr.msk.f32.mxu0 %vm104_vm1, %v717_v32 }
 0x436   :  { %952 = vmatmul.mubr.msk.f32.vlgmr.msra.gmra.mrb[6].mxu0 %vm104_vm1, %v719_v35 }
 0x501   :  { %v933_v36 = vpop.f32.mrb[2].mxu0 }
 0x502   :  { %808 = vrot.lane.b32.xlu1 %v933_v36, %s1016_s2  ;;  %v401_v37 = vpop.f32.mrb[3].mxu0 }
 0x503   :  { %806 = vrot.lane.b32.xlu0 %v401_v37, %s1016_s2 }
 0x505   :  { %v943_v38 = vpop.f32.mrb[4].mxu0 }
 0x506   :  { %816 = vrot.lane.b32.xlu1 %v943_v38, %s1017_s15  ;;  %v598_v39 = vpop.f32.mrb[5].mxu0 }
 0x509   :  { %v953_v40 = vpop.f32.mrb[6].mxu0 }
 0x50a   :  { %814 = vrot.lane.b32.xlu1 %v598_v39, %s1017_s15  ;;  %v795_v41 = vpop.f32.mrb[7].mxu0 }
 0x50b   :  { %822 = vrot.lane.b32.xlu0 %v795_v41, %s1018_s16 }
 0x50e   :  { %824 = vrot.lane.b32.xlu1 %v953_v40, %s1018_s16 }
 0x574   :  { %v809_v42 = vpop.permute.xlu1 %808 }
 0x575   :  { %v807_v44 = vpop.permute.xlu0 %806  ;;  %v829_v50 = vsel %vm19_vm0, %v1105_v33, %v809_v42 }
 0x576   :  { %v828_v45 = vsel %vm19_vm0, %v1107_v34, %v807_v44 }
 0x578   :  { %v817_v43 = vpop.permute.xlu1 %816 }
 0x579   :  { %v832_v51 = vsel %vm830_vm5, %v829_v50, %v817_v43 }
 0x57c   :  { %v815_v46 = vpop.permute.xlu1 %814 }
 0x57d   :  { %v831_v47 = vsel %vm830_vm5, %v828_v45, %v815_v46  ;;  %v823_v48 = vpop.permute.xlu0 %822 }
 0x57e   :  { %v834_v49 = vsel %vm833_vm4, %v831_v47, %v823_v48 }
 0x57f   :  { %836 = vst [vmem:[#allocation2] sm:$0xff] %v834_v49 }
 0x580   :  { %v825_v52 = vpop.permute.xlu1 %824 }
 0x581   :  { %v835_v53 = vsel %vm833_vm4, %v832_v51, %v825_v52 }
 0x582   :  { %837 = vst [vmem:[#allocation2 + $0x8] sm:$0x3] %v835_v53 }
 0x583   :  { %1003 = shalt.err (!%p1000_p4)
}
 0x584   :  { %s1004_s22 = scalar_lea.hbm %s1161_s3, 256 }
 0x585   :  { %p1005_p5 = scmp.ne.s32.totalorder %s1161_s3, %s1004_s22  ;;  %p1008_p6 = scmp.lt.u32.totalorder %s1004_s22, %s1161_s3 }
 0x587   :  { %p1010_p7 = pnand %p1008_p6, %p1005_p5 }
 0x589   :  { %1013 = shalt.err (!%p1010_p7)
}
 0x58a   :  { %s1020_s27 = smov 128   ;;  %s1021_s28 = smov 8  }
 0x58b   :  { %849 = dma.vmem_to_hbm [thread:$0]  %s844_s18, 256, %s1161_s3, [#allocation3], %s1020_s27, %s1020_s27, %s1021_s28  }
 0x58c   :  { %1014 = dma.done.wait [#allocation3], 256  }
 0x58d   :  { %1015 = vsyncadd [#allocation3], 4294967040 }
 0x58e   :  { %853 = vsyncpa [#allocation3], 1 }

</bundles_post_ra>
